<compile_context>
chip_gen: v7x
topology: tpu7x:2x2x1
jax: 0.10.0
libtpu: 0.0.40
codegen_flags: <defaults>
</compile_context>

<pallas_src>
import math

import jax
import jax.numpy as jnp
from jax import lax
from jax.experimental import pallas as pl
from jax.experimental.pallas import tpu as pltpu

LANE = 128


# ------------------------------- kernel ------------------------------------ #

def _cross(u, v):
    ux, uy, uz = u
    vx, vy, vz = v
    return (uy * vz - uz * vy, uz * vx - ux * vz, ux * vy - uy * vx)


def _dot3(u, v):
    return u[0] * v[0] + u[1] * v[1] + u[2] * v[2]


def _shifted(cur, nxt, delta, lane_idx):
    """Value at flattened folded index j + delta (j = row*128 + lane).

    cur[r, l] = flat[r*128 + l],  nxt[r, l] = flat[(r+1)*128 + l].
    Lanes whose shift crosses a batch/block boundary only ever correspond to
    dihedral indices >= L (the padded tail) and are cropped in the wrapper.
    """
    # roll(x, s)[i] == x[i - s]  ->  "shift left by delta" == roll by 128-delta.
    same_row = pltpu.roll(cur, shift=LANE - delta, axis=1)   # cur[r, l+delta]
    next_row = pltpu.roll(nxt, shift=LANE - delta, axis=1)   # nxt[r, l+delta-128]
    return jnp.where(lane_idx < LANE - delta, same_row, next_row)


def dihedral_kernel(coords_ref, out_ref):
    """coords_ref: (3, R, 128) f32 — xyz-major, rows = folded (batch, chunk).
       out_ref   : (2, R, 128) f32 — [sin, cos] at the same folded position."""
    rows = coords_ref.shape[1]
    lane_idx = lax.broadcasted_iota(jnp.int32, (rows, LANE), 1)

    cur = [coords_ref[k] for k in range(3)]                   # (R, 128) slabs
    nxt = [pltpu.roll(p, shift=rows - 1, axis=0) if rows > 1 else p
           for p in cur]                                      # next-row view

    a = cur                                                   # coords[j]
    b = [_shifted(cur[k], nxt[k], 1, lane_idx) for k in range(3)]   # coords[j+1]
    c = [_shifted(cur[k], nxt[k], 2, lane_idx) for k in range(3)]   # coords[j+2]
    d = [_shifted(cur[k], nxt[k], 3, lane_idx) for k in range(3)]   # coords[j+3]

    # bc = F.normalize(b - c + 1e-8):  v / max(||v||, 1e-12)
    bmc = [bi - ci + 1e-8 for bi, ci in zip(b, c)]
    inv_nrm = lax.rsqrt(jnp.maximum(_dot3(bmc, bmc), 1e-24))          # EUP
    bc = [v * inv_nrm for v in bmc]

    amb = [ai - bi for ai, bi in zip(a, b)]
    cmd = [ci - di for ci, di in zip(c, d)]
    n1 = _cross(amb, bc)
    n2 = _cross(bc, cmd)

    x = _dot3(n1, n2) + 1e-8                     # torch: atan2(y, x + 1e-8)
    y = _dot3(_cross(n1, bc), n2)

    # sin(atan2(y,x)) = y/hypot, cos(atan2(y,x)) = x/hypot.
    # (f32 only: assumes |n1|,|n2| stay well below ~1e19 so x^2+y^2 is finite.)
    h2 = x * x + y * y
    inv_h = lax.rsqrt(jnp.maximum(h2, 1e-30))                         # EUP
    sin_d = y * inv_h
    cos_d = jnp.where(h2 > 0.0, x * inv_h, 1.0)      # atan2(0,0)=0 -> cos=1

    out_ref[...] = jnp.stack([sin_d, cos_d], axis=0)  # single dense store


# ------------------------------- wrapper ------------------------------------ #

def _batches_per_block(batch, chunks):
    """Batches per grid block; keeps block rows (= g*chunks) a multiple of 8."""
    step = 8 // math.gcd(chunks, 8)        # smallest g with g*chunks % 8 == 0
    target_rows = 256                      # ~0.7 MB of f32 in+out per block
    g = max(step, (max(1, target_rows // chunks) // step) * step)
    if batch <= g:                         # whole problem fits in one block
        g = ((batch + step - 1) // step) * step
    return g


@jax.jit
def cartesian_to_dihedral(inputs):
    """Pallas forward of CartesianToDihedral (return_angles=False).

    inputs : (B, num_res, 3, 3), num_res >= 9
    returns: angles (B, 2*(3*num_res - 3)) = [all sins | all coss],
             first_three (B, 3, 3)
    """
    B, num_res = inputs.shape[0], inputs.shape[1]
    assert num_res >= 9, "torch front-end reshape is only a pure reshape for num_res >= 9"
    M = 3 * num_res
    L = M - 3

    inputs = inputs.astype(jnp.float32)
    first_three = inputs[:, 0]                       # == coords[:, :3, :]

    # Fold the atom axis into (chunks, 128) lanes with xyz outermost; fold the
    # (padded) batch into the row axis so blocks are (8k, 128)-shaped.
    chunks = pl.cdiv(M, LANE)
    m_pad = chunks * LANE
    g = _batches_per_block(B, chunks)
    b_pad = pl.cdiv(B, g) * g
    rows, block_rows = b_pad * chunks, g * chunks

    coords = inputs.reshape(B, M, 3)
    coords = jnp.pad(coords, ((0, b_pad - B), (0, m_pad - M), (0, 0)))
    # One minor-dim transpose: (b_pad, chunks, 128, 3) -> (3, b_pad, chunks, 128).
    coords = coords.reshape(b_pad, chunks, LANE, 3).transpose(3, 0, 1, 2)
    coords = coords.reshape(3, rows, LANE)

    out = pl.pallas_call(
        dihedral_kernel,
        out_shape=jax.ShapeDtypeStruct((2, rows, LANE), jnp.float32),
        grid=(rows // block_rows,),
        in_specs=[pl.BlockSpec((3, block_rows, LANE), lambda i: (0, i, 0))],
        out_specs=pl.BlockSpec((2, block_rows, LANE), lambda i: (0, i, 0)),
        compiler_params=pltpu.CompilerParams(
            dimension_semantics=("parallel",)),
    )(coords)

    # (2, rows, 128) -> (2, b_pad, m_pad) is a free reshape; crop the padding.
    out = out.reshape(2, b_pad, m_pad)[:, :B, :L]
    angles = jnp.transpose(out, (1, 0, 2)).reshape(B, 2 * L)   # [sins | coss]
    return angles, first_three


# ------------------------------- reference ---------------------------------- #

def _ref_forward(inputs):
    B, num_res = inputs.shape[0], inputs.shape[1]
    coords = inputs.astype(jnp.float32).reshape(B, 3 * num_res, 3)
    a, b, c, d = coords[:, :-3], coords[:, 1:-2], coords[:, 2:-1], coords[:, 3:]
    bmc = b - c + 1e-8
    bc = bmc / jnp.maximum(jnp.linalg.norm(bmc, axis=-1, keepdims=True), 1e-12)
    n1 = jnp.cross(a - b, bc)
    n2 = jnp.cross(bc, c - d)
    x = jnp.sum(n1 * n2, -1)
    y = jnp.sum(jnp.cross(n1, bc) * n2, -1)
    dih = jnp.arctan2(y, x + 1e-8)
    angles = jnp.concatenate([jnp.sin(dih), jnp.cos(dih)], axis=-1)
    return angles, coords[:, :3, :]


# --------------------------------- main -------------------------------------- #

if __name__ == "__main__":
    key = jax.random.PRNGKey(0)
    # num_res=48 -> M=144 atoms: exercises the cross-row (lane 125..127) shift
    # path; num_res=12 -> M=36: exercises the single-chunk / heavy-padding path.
    for B, num_res in ((2, 48), (2, 12)):
        x = jax.random.normal(key, (B, num_res, 3, 3), dtype=jnp.float32)

        angles, first_three = cartesian_to_dihedral(x)
        angles = jax.block_until_ready(angles)
        first_three = jax.block_until_ready(first_three)

        ref_angles, ref_first = _ref_forward(x)
        L = 3 * num_res - 3
        assert angles.shape == (B, 2 * L)
        assert first_three.shape == (B, 3, 3)
        assert jnp.allclose(angles, ref_angles, atol=1e-4, rtol=1e-4), (
            B, num_res, float(jnp.max(jnp.abs(angles - ref_angles))))
        assert jnp.allclose(first_three, ref_first)

    # TODO(synk): return_angles=True branch omitted — in the PyTorch source it
    # calls torch.cat on an always-empty list and would raise.
    print("KERNEL_OK")
</pallas_src>

<mosaic_0001>
module attributes {stable_mosaic.version = 11 : i64} {
  func.func @dihedral_kernel(%arg0: i32, %arg1: memref<3x8x128xf32, #tpu.memory_space<vmem>>, %arg2: memref<2x8x128xf32, #tpu.memory_space<vmem>>) attributes {dimension_semantics = [#tpu.dimension_semantics<parallel>], iteration_bounds = array<i64: 1>, scalar_prefetch = 0 : i64, scratch_operands = 0 : i64, tpu.core_type = #tpu.core_type<tc>, window_params = [{transform_indices = @transform_0, window_bounds = array<i64: 3, 8, 128>}, {transform_indices = @transform_1, window_bounds = array<i64: 2, 8, 128>}]} {
    %0 = tpu.iota {dimensions = array<i32: 1>} : vector<8x128xi32>
    %c0 = arith.constant 0 : index
    %c0_0 = arith.constant 0 : index
    %c0_1 = arith.constant 0 : index
    %1 = vector.load %arg1[%c0, %c0_0, %c0_1] : memref<3x8x128xf32, #tpu.memory_space<vmem>>, vector<1x8x128xf32>
    %2 = vector.shape_cast %1 : vector<1x8x128xf32> to vector<8x128xf32>
    %c1 = arith.constant 1 : index
    %c0_2 = arith.constant 0 : index
    %c0_3 = arith.constant 0 : index
    %3 = vector.load %arg1[%c1, %c0_2, %c0_3] : memref<3x8x128xf32, #tpu.memory_space<vmem>>, vector<1x8x128xf32>
    %4 = vector.shape_cast %3 : vector<1x8x128xf32> to vector<8x128xf32>
    %c2 = arith.constant 2 : index
    %c0_4 = arith.constant 0 : index
    %c0_5 = arith.constant 0 : index
    %5 = vector.load %arg1[%c2, %c0_4, %c0_5] : memref<3x8x128xf32, #tpu.memory_space<vmem>>, vector<1x8x128xf32>
    %6 = vector.shape_cast %5 : vector<1x8x128xf32> to vector<8x128xf32>
    %c7_i32 = arith.constant 7 : i32
    %7 = tpu.dynamic_rotate %2 by %c7_i32 dim 0 : vector<8x128xf32>, i32 -> vector<8x128xf32>
    %c7_i32_6 = arith.constant 7 : i32
    %8 = tpu.dynamic_rotate %4 by %c7_i32_6 dim 0 : vector<8x128xf32>, i32 -> vector<8x128xf32>
    %c7_i32_7 = arith.constant 7 : i32
    %9 = tpu.dynamic_rotate %6 by %c7_i32_7 dim 0 : vector<8x128xf32>, i32 -> vector<8x128xf32>
    %c127_i32 = arith.constant 127 : i32
    %10 = tpu.dynamic_rotate %2 by %c127_i32 dim 1 : vector<8x128xf32>, i32 -> vector<8x128xf32>
    %c127_i32_8 = arith.constant 127 : i32
    %11 = tpu.dynamic_rotate %7 by %c127_i32_8 dim 1 : vector<8x128xf32>, i32 -> vector<8x128xf32>
    %c127_i32_9 = arith.constant 127 : i32
    %12 = vector.broadcast %c127_i32_9 : i32 to vector<8x128xi32>
    %13 = arith.cmpi slt, %0, %12 : vector<8x128xi32>
    %14 = arith.select %13, %10, %11 : vector<8x128xi1>, vector<8x128xf32>
    %c127_i32_10 = arith.constant 127 : i32
    %15 = tpu.dynamic_rotate %4 by %c127_i32_10 dim 1 : vector<8x128xf32>, i32 -> vector<8x128xf32>
    %c127_i32_11 = arith.constant 127 : i32
    %16 = tpu.dynamic_rotate %8 by %c127_i32_11 dim 1 : vector<8x128xf32>, i32 -> vector<8x128xf32>
    %c127_i32_12 = arith.constant 127 : i32
    %17 = vector.broadcast %c127_i32_12 : i32 to vector<8x128xi32>
    %18 = arith.cmpi slt, %0, %17 : vector<8x128xi32>
    %19 = arith.select %18, %15, %16 : vector<8x128xi1>, vector<8x128xf32>
    %c127_i32_13 = arith.constant 127 : i32
    %20 = tpu.dynamic_rotate %6 by %c127_i32_13 dim 1 : vector<8x128xf32>, i32 -> vector<8x128xf32>
    %c127_i32_14 = arith.constant 127 : i32
    %21 = tpu.dynamic_rotate %9 by %c127_i32_14 dim 1 : vector<8x128xf32>, i32 -> vector<8x128xf32>
    %c127_i32_15 = arith.constant 127 : i32
    %22 = vector.broadcast %c127_i32_15 : i32 to vector<8x128xi32>
    %23 = arith.cmpi slt, %0, %22 : vector<8x128xi32>
    %24 = arith.select %23, %20, %21 : vector<8x128xi1>, vector<8x128xf32>
    %c126_i32 = arith.constant 126 : i32
    %25 = tpu.dynamic_rotate %2 by %c126_i32 dim 1 : vector<8x128xf32>, i32 -> vector<8x128xf32>
    %c126_i32_16 = arith.constant 126 : i32
    %26 = tpu.dynamic_rotate %7 by %c126_i32_16 dim 1 : vector<8x128xf32>, i32 -> vector<8x128xf32>
    %c126_i32_17 = arith.constant 126 : i32
    %27 = vector.broadcast %c126_i32_17 : i32 to vector<8x128xi32>
    %28 = arith.cmpi slt, %0, %27 : vector<8x128xi32>
    %29 = arith.select %28, %25, %26 : vector<8x128xi1>, vector<8x128xf32>
    %c126_i32_18 = arith.constant 126 : i32
    %30 = tpu.dynamic_rotate %4 by %c126_i32_18 dim 1 : vector<8x128xf32>, i32 -> vector<8x128xf32>
    %c126_i32_19 = arith.constant 126 : i32
    %31 = tpu.dynamic_rotate %8 by %c126_i32_19 dim 1 : vector<8x128xf32>, i32 -> vector<8x128xf32>
    %c126_i32_20 = arith.constant 126 : i32
    %32 = vector.broadcast %c126_i32_20 : i32 to vector<8x128xi32>
    %33 = arith.cmpi slt, %0, %32 : vector<8x128xi32>
    %34 = arith.select %33, %30, %31 : vector<8x128xi1>, vector<8x128xf32>
    %c126_i32_21 = arith.constant 126 : i32
    %35 = tpu.dynamic_rotate %6 by %c126_i32_21 dim 1 : vector<8x128xf32>, i32 -> vector<8x128xf32>
    %c126_i32_22 = arith.constant 126 : i32
    %36 = tpu.dynamic_rotate %9 by %c126_i32_22 dim 1 : vector<8x128xf32>, i32 -> vector<8x128xf32>
    %c126_i32_23 = arith.constant 126 : i32
    %37 = vector.broadcast %c126_i32_23 : i32 to vector<8x128xi32>
    %38 = arith.cmpi slt, %0, %37 : vector<8x128xi32>
    %39 = arith.select %38, %35, %36 : vector<8x128xi1>, vector<8x128xf32>
    %c125_i32 = arith.constant 125 : i32
    %40 = tpu.dynamic_rotate %2 by %c125_i32 dim 1 : vector<8x128xf32>, i32 -> vector<8x128xf32>
    %c125_i32_24 = arith.constant 125 : i32
    %41 = tpu.dynamic_rotate %7 by %c125_i32_24 dim 1 : vector<8x128xf32>, i32 -> vector<8x128xf32>
    %c125_i32_25 = arith.constant 125 : i32
    %42 = vector.broadcast %c125_i32_25 : i32 to vector<8x128xi32>
    %43 = arith.cmpi slt, %0, %42 : vector<8x128xi32>
    %44 = arith.select %43, %40, %41 : vector<8x128xi1>, vector<8x128xf32>
    %c125_i32_26 = arith.constant 125 : i32
    %45 = tpu.dynamic_rotate %4 by %c125_i32_26 dim 1 : vector<8x128xf32>, i32 -> vector<8x128xf32>
    %c125_i32_27 = arith.constant 125 : i32
    %46 = tpu.dynamic_rotate %8 by %c125_i32_27 dim 1 : vector<8x128xf32>, i32 -> vector<8x128xf32>
    %c125_i32_28 = arith.constant 125 : i32
    %47 = vector.broadcast %c125_i32_28 : i32 to vector<8x128xi32>
    %48 = arith.cmpi slt, %0, %47 : vector<8x128xi32>
    %49 = arith.select %48, %45, %46 : vector<8x128xi1>, vector<8x128xf32>
    %c125_i32_29 = arith.constant 125 : i32
    %50 = tpu.dynamic_rotate %6 by %c125_i32_29 dim 1 : vector<8x128xf32>, i32 -> vector<8x128xf32>
    %c125_i32_30 = arith.constant 125 : i32
    %51 = tpu.dynamic_rotate %9 by %c125_i32_30 dim 1 : vector<8x128xf32>, i32 -> vector<8x128xf32>
    %c125_i32_31 = arith.constant 125 : i32
    %52 = vector.broadcast %c125_i32_31 : i32 to vector<8x128xi32>
    %53 = arith.cmpi slt, %0, %52 : vector<8x128xi32>
    %54 = arith.select %53, %50, %51 : vector<8x128xi1>, vector<8x128xf32>
    %55 = arith.subf %14, %29 : vector<8x128xf32>
    %cst = arith.constant 9.99999993E-9 : f32
    %56 = vector.broadcast %cst : f32 to vector<8x128xf32>
    %57 = arith.addf %55, %56 : vector<8x128xf32>
    %58 = arith.subf %19, %34 : vector<8x128xf32>
    %cst_32 = arith.constant 9.99999993E-9 : f32
    %59 = vector.broadcast %cst_32 : f32 to vector<8x128xf32>
    %60 = arith.addf %58, %59 : vector<8x128xf32>
    %61 = arith.subf %24, %39 : vector<8x128xf32>
    %cst_33 = arith.constant 9.99999993E-9 : f32
    %62 = vector.broadcast %cst_33 : f32 to vector<8x128xf32>
    %63 = arith.addf %61, %62 : vector<8x128xf32>
    %64 = arith.mulf %57, %57 : vector<8x128xf32>
    %65 = arith.mulf %60, %60 : vector<8x128xf32>
    %66 = arith.addf %64, %65 : vector<8x128xf32>
    %67 = arith.mulf %63, %63 : vector<8x128xf32>
    %68 = arith.addf %66, %67 : vector<8x128xf32>
    %cst_34 = arith.constant 1.000000e-24 : f32
    %69 = vector.broadcast %cst_34 : f32 to vector<8x128xf32>
    %70 = arith.maximumf %68, %69 : vector<8x128xf32>
    %71 = math.rsqrt %70 : vector<8x128xf32>
    %72 = arith.mulf %57, %71 : vector<8x128xf32>
    %73 = arith.mulf %60, %71 : vector<8x128xf32>
    %74 = arith.mulf %63, %71 : vector<8x128xf32>
    %75 = arith.subf %2, %14 : vector<8x128xf32>
    %76 = arith.subf %4, %19 : vector<8x128xf32>
    %77 = arith.subf %6, %24 : vector<8x128xf32>
    %78 = arith.subf %29, %44 : vector<8x128xf32>
    %79 = arith.subf %34, %49 : vector<8x128xf32>
    %80 = arith.subf %39, %54 : vector<8x128xf32>
    %81 = arith.mulf %76, %74 : vector<8x128xf32>
    %82 = arith.mulf %77, %73 : vector<8x128xf32>
    %83 = arith.subf %81, %82 : vector<8x128xf32>
    %84 = arith.mulf %77, %72 : vector<8x128xf32>
    %85 = arith.mulf %75, %74 : vector<8x128xf32>
    %86 = arith.subf %84, %85 : vector<8x128xf32>
    %87 = arith.mulf %75, %73 : vector<8x128xf32>
    %88 = arith.mulf %76, %72 : vector<8x128xf32>
    %89 = arith.subf %87, %88 : vector<8x128xf32>
    %90 = arith.mulf %73, %80 : vector<8x128xf32>
    %91 = arith.mulf %74, %79 : vector<8x128xf32>
    %92 = arith.subf %90, %91 : vector<8x128xf32>
    %93 = arith.mulf %74, %78 : vector<8x128xf32>
    %94 = arith.mulf %72, %80 : vector<8x128xf32>
    %95 = arith.subf %93, %94 : vector<8x128xf32>
    %96 = arith.mulf %72, %79 : vector<8x128xf32>
    %97 = arith.mulf %73, %78 : vector<8x128xf32>
    %98 = arith.subf %96, %97 : vector<8x128xf32>
    %99 = arith.mulf %83, %92 : vector<8x128xf32>
    %100 = arith.mulf %86, %95 : vector<8x128xf32>
    %101 = arith.addf %99, %100 : vector<8x128xf32>
    %102 = arith.mulf %89, %98 : vector<8x128xf32>
    %103 = arith.addf %101, %102 : vector<8x128xf32>
    %cst_35 = arith.constant 9.99999993E-9 : f32
    %104 = vector.broadcast %cst_35 : f32 to vector<8x128xf32>
    %105 = arith.addf %103, %104 : vector<8x128xf32>
    %106 = arith.mulf %86, %74 : vector<8x128xf32>
    %107 = arith.mulf %89, %73 : vector<8x128xf32>
    %108 = arith.subf %106, %107 : vector<8x128xf32>
    %109 = arith.mulf %89, %72 : vector<8x128xf32>
    %110 = arith.mulf %83, %74 : vector<8x128xf32>
    %111 = arith.subf %109, %110 : vector<8x128xf32>
    %112 = arith.mulf %83, %73 : vector<8x128xf32>
    %113 = arith.mulf %86, %72 : vector<8x128xf32>
    %114 = arith.subf %112, %113 : vector<8x128xf32>
    %115 = arith.mulf %108, %92 : vector<8x128xf32>
    %116 = arith.mulf %111, %95 : vector<8x128xf32>
    %117 = arith.addf %115, %116 : vector<8x128xf32>
    %118 = arith.mulf %114, %98 : vector<8x128xf32>
    %119 = arith.addf %117, %118 : vector<8x128xf32>
    %120 = arith.mulf %105, %105 : vector<8x128xf32>
    %121 = arith.mulf %119, %119 : vector<8x128xf32>
    %122 = arith.addf %120, %121 : vector<8x128xf32>
    %cst_36 = arith.constant 1.000000e-30 : f32
    %123 = vector.broadcast %cst_36 : f32 to vector<8x128xf32>
    %124 = arith.maximumf %122, %123 : vector<8x128xf32>
    %125 = math.rsqrt %124 : vector<8x128xf32>
    %126 = arith.mulf %119, %125 : vector<8x128xf32>
    %cst_37 = arith.constant 0.000000e+00 : f32
    %127 = vector.broadcast %cst_37 : f32 to vector<8x128xf32>
    %128 = arith.cmpf ogt, %122, %127 : vector<8x128xf32>
    %129 = arith.mulf %105, %125 : vector<8x128xf32>
    %cst_38 = arith.constant 1.000000e+00 : f32
    %130 = vector.broadcast %cst_38 : f32 to vector<8x128xf32>
    %131 = arith.select %128, %129, %130 : vector<8x128xi1>, vector<8x128xf32>
    %132 = vector.shape_cast %126 : vector<8x128xf32> to vector<1x8x128xf32>
    %133 = vector.shape_cast %131 : vector<8x128xf32> to vector<1x8x128xf32>
    %134 = tpu.concatenate %132, %133 in 0 : vector<1x8x128xf32>, vector<1x8x128xf32> -> vector<2x8x128xf32>
    %c0_39 = arith.constant 0 : index
    %c0_40 = arith.constant 0 : index
    %c0_41 = arith.constant 0 : index
    %135 = vector.load %arg2[%c0_39, %c0_40, %c0_41] : memref<2x8x128xf32, #tpu.memory_space<vmem>>, vector<2x8x128xf32>
    tpu.vector_store %arg2[%c0_39, %c0_40, %c0_41], %134 {strides = array<i32>} : memref<2x8x128xf32, #tpu.memory_space<vmem>>, vector<2x8x128xf32>,
    return
  }
  func.func @transform_0(%arg0: i32) -> (i32, i32, i32) {
    %c0_i32 = arith.constant 0 : i32
    %c0_i32_0 = arith.constant 0 : i32
    %c0_i32_1 = arith.constant 0 : i32
    return %c0_i32, %arg0, %c0_i32_0 : i32, i32, i32
  }
  func.func @transform_1(%arg0: i32) -> (i32, i32, i32) {
    %c0_i32 = arith.constant 0 : i32
    %c0_i32_0 = arith.constant 0 : i32
    %c0_i32_1 = arith.constant 0 : i32
    return %c0_i32, %arg0, %c0_i32_0 : i32, i32, i32
  }
}

</mosaic_0001>

<bundles_post_ra>
// kernel: cartesian_to_dihedral.1
= control target key start
LH: loop header
LB: loop body
LE: loop exit
PB: predicated region body
PF: predicated region fallthrough
CT: control target
= control target key end

     0   :  { %s150_s10 = smov 127   ;;  %s151_s11 = smov 126   ;;  %v8_v8 = vlaneseq  ;;  %s198_s0 = inlined_call_operand.vmem [shape: f32[3,8,128], index: 0, kind: input, shape index: {}]   ;;  %s199_s1 = inlined_call_operand.vmem [shape: f32[2,8,128], index: 1, kind: output, shape index: {}]  }
   0x1   :  { %v166_v0 = vld [vmem:[%s198_s0 + $0x8] sm:$0xff]  ;;  %v171_v1 = vld [vmem:[%s198_s0] sm:$0xff]  ;;  %v142_v4 = vld [vmem:[%s198_s0 + $0x10] sm:$0xff]  ;;  %s152_s14 = smov 125  }
   0x2   :  { %24 = vrot.lane.b32.xlu1 %v166_v0, %s150_s10  ;;  %18 = vrot.lane.b32.xlu0 %v171_v1, %s150_s10  ;;  %v16_v2 = vrot.slane %v166_v0, 1  ;;  %v15_v3 = vrot.slane %v171_v1, 1  ;;  %v17_v5 = vrot.slane %v142_v4, 1  ;;  %v9_v11 = vand.u32 127, %v8_v8 }
   0x4   :  { %vm22_vm0 = vcmp.lt.s32.totalorder %v9_v11, 127  ;;  %vm38_vm1 = vcmp.lt.s32.totalorder %v9_v11, 126  ;;  %vm54_vm2 = vcmp.lt.s32.totalorder %v9_v11, 125 }
   0x6   :  { %26 = vrot.lane.b32.xlu1 %v16_v2, %s150_s10  ;;  %20 = vrot.lane.b32.xlu0 %v15_v3, %s150_s10 }
   0xa   :  { %36 = vrot.lane.b32.xlu1 %v15_v3, %s151_s11  ;;  %34 = vrot.lane.b32.xlu0 %v171_v1, %s151_s11 }
   0xe   :  { %42 = vrot.lane.b32.xlu1 %v16_v2, %s151_s11  ;;  %40 = vrot.lane.b32.xlu0 %v166_v0, %s151_s11 }
  0x12   :  { %31 = vrot.lane.b32.xlu1 %v17_v5, %s150_s10  ;;  %29 = vrot.lane.b32.xlu0 %v142_v4, %s150_s10 }
  0x16   :  { %47 = vrot.lane.b32.xlu1 %v17_v5, %s151_s11  ;;  %45 = vrot.lane.b32.xlu0 %v142_v4, %s151_s11 }
  0x1a   :  { %52 = vrot.lane.b32.xlu1 %v15_v3, %s152_s14  ;;  %50 = vrot.lane.b32.xlu0 %v171_v1, %s152_s14 }
  0x1e   :  { %58 = vrot.lane.b32.xlu1 %v16_v2, %s152_s14  ;;  %56 = vrot.lane.b32.xlu0 %v166_v0, %s152_s14 }
  0x22   :  { %63 = vrot.lane.b32.xlu1 %v17_v5, %s152_s14  ;;  %61 = vrot.lane.b32.xlu0 %v142_v4, %s152_s14 }
  0x74   :  { %v25_v6 = vpop.permute.xlu1 %24  ;;  %v19_v7 = vpop.permute.xlu0 %18 }
  0x78   :  { %v27_v9 = vpop.permute.xlu1 %26  ;;  %v21_v10 = vpop.permute.xlu0 %20 }
  0x79   :  { %v28_v16 = vsel %vm22_vm0, %v25_v6, %v27_v9  ;;  %v23_v20 = vsel %vm22_vm0, %v19_v7, %v21_v10 }
  0x7a   :  { %v83_v48 = vsub.f32 %v166_v0, %v28_v16  ;;  %v82_v54 = vsub.f32 %v171_v1, %v23_v20 }
  0x7c   :  { %v37_v12 = vpop.permute.xlu1 %36  ;;  %v35_v13 = vpop.permute.xlu0 %34 }
  0x7d   :  { %v39_v17 = vsel %vm38_vm1, %v35_v13, %v37_v12 }
  0x7e   :  { %v66_v21 = vsub.f32 %v23_v20, %v39_v17 }
  0x80   :  { %v43_v14 = vpop.permute.xlu1 %42  ;;  %v41_v15 = vpop.permute.xlu0 %40  ;;  %v67_v25 = vadd.f32 1e-08, %v66_v21 }
  0x81   :  { %v44_v18 = vsel %vm38_vm1, %v41_v15, %v43_v14 }
  0x82   :  { %v68_v19 = vsub.f32 %v28_v16, %v44_v18  ;;  %v72_v32 = vmul.f32 %v67_v25, %v67_v25 }
  0x84   :  { %v32_v22 = vpop.permute.xlu1 %31  ;;  %v30_v23 = vpop.permute.xlu0 %29  ;;  %v69_v24 = vadd.f32 1e-08, %v68_v19 }
  0x85   :  { %v33_v28 = vsel %vm22_vm0, %v30_v23, %v32_v22 }
  0x86   :  { %v73_v30 = vmul.f32 %v69_v24, %v69_v24  ;;  %v84_v49 = vsub.f32 %v142_v4, %v33_v28 }
  0x88   :  { %v48_v26 = vpop.permute.xlu1 %47  ;;  %v46_v27 = vpop.permute.xlu0 %45  ;;  %v74_v34 = vadd.f32 %v73_v30, %v72_v32 }
  0x89   :  { %v49_v29 = vsel %vm38_vm1, %v46_v27, %v48_v26 }
  0x8a   :  { %v70_v31 = vsub.f32 %v33_v28, %v49_v29 }
  0x8c   :  { %v71_v33 = vadd.f32 1e-08, %v70_v31  ;;  %v53_v36 = vpop.permute.xlu1 %52  ;;  %v51_v37 = vpop.permute.xlu0 %50 }
  0x8d   :  { %v55_v44 = vsel %vm54_vm2, %v51_v37, %v53_v36 }
  0x8e   :  { %v75_v35 = vmul.f32 %v71_v33, %v71_v33  ;;  %v85_v52 = vsub.f32 %v39_v17, %v55_v44 }
  0x90   :  { %v76_v38 = vadd.f32 %v75_v35, %v74_v34  ;;  %v59_v40 = vpop.permute.xlu1 %58  ;;  %v57_v41 = vpop.permute.xlu0 %56 }
  0x91   :  { %v60_v45 = vsel %vm54_vm2, %v57_v41, %v59_v40 }
  0x92   :  { %v77_v39 = vmax.f32 %v76_v38, 1e-24  ;;  %v86_v55 = vsub.f32 %v44_v18, %v60_v45 }
  0x94   :  { %146 = vrsqrt.f32 %v77_v39  ;;  %v64_v42 = vpop.permute.xlu1 %63  ;;  %v62_v43 = vpop.permute.xlu0 %61 }
  0x95   :  { %v65_v46 = vsel %vm54_vm2, %v62_v43, %v64_v42 }
  0x96   :  { %v87_v56 = vsub.f32 %v49_v29, %v65_v46 }
  0x9e   :  { %v147_v47 = vpop.eup %146 }
  0x9f   :  { %v81_v50 = vmul.f32 %v147_v47, %v71_v33  ;;  %v80_v51 = vmul.f32 %v147_v47, %v69_v24  ;;  %v79_v53 = vmul.f32 %v147_v47, %v67_v25 }
  0xa1   :  { %v100_v57 = vmul.f32 %v85_v52, %v81_v50  ;;  %v104_v58 = vmul.f32 %v85_v52, %v80_v51  ;;  %v88_v59 = vmul.f32 %v83_v48, %v81_v50  ;;  %v89_v60 = vmul.f32 %v84_v49, %v80_v51 }
  0xa2   :  { %v91_v61 = vmul.f32 %v84_v49, %v79_v53  ;;  %v92_v62 = vmul.f32 %v82_v54, %v81_v50  ;;  %v94_v63 = vmul.f32 %v82_v54, %v80_v51  ;;  %v95_v2 = vmul.f32 %v83_v48, %v79_v53 }
  0xa3   :  { %v90_v3 = vsub.f32 %v88_v59, %v89_v60  ;;  %v98_v5 = vmul.f32 %v86_v55, %v81_v50  ;;  %v103_v0 = vmul.f32 %v86_v55, %v79_v53  ;;  %v97_v4 = vmul.f32 %v87_v56, %v80_v51 }
  0xa4   :  { %v93_v6 = vsub.f32 %v91_v61, %v92_v62  ;;  %v96_v7 = vsub.f32 %v94_v63, %v95_v2  ;;  %v101_v8 = vmul.f32 %v87_v56, %v79_v53 }
  0xa5   :  { %v118_v9 = vmul.f32 %v90_v3, %v80_v51  ;;  %v116_v10 = vmul.f32 %v90_v3, %v81_v50  ;;  %v99_v1 = vsub.f32 %v97_v4, %v98_v5  ;;  %v105_v15 = vsub.f32 %v103_v0, %v104_v58 }
  0xa6   :  { %v119_v11 = vmul.f32 %v93_v6, %v79_v53  ;;  %v112_v12 = vmul.f32 %v93_v6, %v81_v50  ;;  %v113_v13 = vmul.f32 %v96_v7, %v80_v51  ;;  %v115_v14 = vmul.f32 %v96_v7, %v79_v53 }
  0xa7   :  { %v102_v16 = vsub.f32 %v100_v57, %v101_v8  ;;  %v106_v17 = vmul.f32 %v99_v1, %v90_v3  ;;  %v109_v24 = vmul.f32 %v105_v15, %v96_v7 }
  0xa8   :  { %v120_v18 = vsub.f32 %v118_v9, %v119_v11  ;;  %v114_v19 = vsub.f32 %v112_v12, %v113_v13  ;;  %v117_v20 = vsub.f32 %v115_v14, %v116_v10 }
  0xa9   :  { %v107_v21 = vmul.f32 %v102_v16, %v93_v6 }
  0xaa   :  { %v121_v22 = vmul.f32 %v114_v19, %v99_v1  ;;  %v122_v23 = vmul.f32 %v117_v20, %v102_v16  ;;  %v124_v26 = vmul.f32 %v120_v18, %v105_v15 }
  0xab   :  { %v108_v25 = vadd.f32 %v107_v21, %v106_v17 }
  0xac   :  { %v123_v27 = vadd.f32 %v122_v23, %v121_v22 }
  0xad   :  { %v110_v28 = vadd.f32 %v109_v24, %v108_v25 }
  0xae   :  { %v125_v29 = vadd.f32 %v124_v26, %v123_v27 }
  0xaf   :  { %v111_v30 = vadd.f32 1e-08, %v110_v28 }
  0xb0   :  { %v127_v31 = vmul.f32 %v125_v29, %v125_v29 }
  0xb1   :  { %v126_v32 = vmul.f32 %v111_v30, %v111_v30 }
  0xb3   :  { %v128_v33 = vadd.f32 %v127_v31, %v126_v32 }
  0xb5   :  { %v129_v34 = vmax.f32 %v128_v33, 1e-30  ;;  %vm132_vm3 = vcmp.gt.f32.partialorder %v128_v33, 0.0 }
  0xb7   :  { %148 = vrsqrt.f32 %v129_v34 }
  0xc1   :  { %v149_v35 = vpop.eup %148 }
  0xc2   :  { %v131_v36 = vmul.f32 %v149_v35, %v125_v29  ;;  %v133_v37 = vmul.f32 %v149_v35, %v111_v30 }
  0xc4   :  { %v134_v38 = vsel %vm132_vm3, %v133_v37, 1.0  ;;  %135 = vst [vmem:[%s199_s1] sm:$0xff] %v131_v36 }
  0xc5   :  { %136 = vst [vmem:[%s199_s1 + $0x8] sm:$0xff] %v134_v38 }

</bundles_post_ra>
